<compile_context>
chip_gen: v7x
topology: tpu7x:2x2x1
jax: 0.10.0
libtpu: 0.0.40
codegen_flags: <defaults>
</compile_context>

<pallas_src>
import functools

import jax
import jax.numpy as jnp
from jax.experimental import pallas as pl
from jax.experimental.pallas import tpu as pltpu

_MIB = 1024 * 1024


def _tpu_vmem_capacity_bytes():
    """Physical per-core VMEM; conservative (v7x-sized) default on failure."""
    try:
        info = pltpu.get_tpu_info()
        cap = int(getattr(info, "vmem_capacity_bytes", 0))
        if cap > 0:
            return cap
    except Exception:
        pass
    return 64 * _MIB


# ----------------------- fast path: single fused streaming pass ---------------------

def _ca_fused_kernel(x_ref, w1t_ref, b1_ref, w2t_ref, b2_ref, o_ref, *, inv_hw):
    # x_ref block: (nb, C, HW) in the input's native dtype.
    x = x_ref[...]

    # AdaptiveAvgPool2d(1): f32-accumulated sum over the spatial lanes, divide
    # by the true H*W.  No full-tile f32 copy of x.
    pooled = jnp.sum(x, axis=2, dtype=jnp.float32) * inv_hw              # (nb, C)

    # conv_du[0]: 1x1 conv C -> C//r + ReLU.
    h = jnp.dot(pooled, w1t_ref[...], preferred_element_type=jnp.float32)
    h = jnp.maximum(h + b1_ref[...], 0.0)                                # (nb, Cr)

    # conv_du[2]: 1x1 conv C//r -> C + Sigmoid.
    y = jnp.dot(h, w2t_ref[...], preferred_element_type=jnp.float32)
    y = jax.nn.sigmoid(y + b2_ref[...])                                  # (nb, C)

    # x * y: broadcast the per-(batch, channel) gate over lanes, native dtype.
    o_ref[...] = x * y[:, :, None].astype(x.dtype)


# ------------------ fallback: two streaming passes, spatial-chunked -----------------

def _pool_kernel(x_ref, sum_ref, *, chunk, hw):
    s = pl.program_id(1)

    @pl.when(s == 0)
    def _():
        sum_ref[...] = jnp.zeros_like(sum_ref)

    x = x_ref[...]                                                       # (1, C, chunk)
    if hw % chunk != 0:
        # Mask the out-of-bounds lanes of the last (partial) spatial chunk.
        lane = jax.lax.broadcasted_iota(jnp.int32, x.shape, 2)
        x = jnp.where(s * chunk + lane < hw, x, 0)
    sum_ref[...] += jnp.sum(x, axis=2, dtype=jnp.float32)[..., None]     # (1, C, 1)


def _scale_kernel(x_ref, g_ref, o_ref):
    x = x_ref[...]                                                       # (1, C, chunk)
    o_ref[...] = x * g_ref[...].astype(x.dtype)                          # gate (1, C, 1)


# --------------------------------------- wrapper ------------------------------------

def ca_layer(x_nchw, w1, b1, w2, b2, *, vmem_budget_bytes=None, donate_x=False):
    """x_nchw: (N, C, H, W); w1: (Cr, C); b1: (Cr,); w2: (C, Cr); b2: (C,)."""
    N, C, H, W = x_nchw.shape
    Cr = w1.shape[0]
    HW = H * W
    itemsize = jnp.dtype(x_nchw.dtype).itemsize

    cap = _tpu_vmem_capacity_bytes()
    two_tensorcores = cap < 100 * _MIB            # v7x-class: 64 MiB/TC, 2 TCs/chip
    hard_budget = max(16 * _MIB, cap - 16 * _MIB)  # leave headroom for compiler scratch
    if vmem_budget_bytes is None:
        budget = hard_budget
    else:
        budget = int(min(vmem_budget_bytes, hard_budget))

    x = x_nchw.reshape(N, C, HW)                  # lanes = spatial, sublanes = channels

    # Row-major squeeze-excite parameters (shared by both paths).
    w1t = jnp.transpose(w1)                       # (C, Cr)
    w2t = jnp.transpose(w2)                       # (Cr, C)
    b1r = b1.reshape(1, Cr)
    b2r = b2.reshape(1, C)

    per_elem = C * HW * itemsize                  # one batch element, one buffer
    max_nb = budget // (4 * per_elem)             # (in + out) x double-buffering

    if max_nb >= 1:
        # ---------------- fast path: one fused streaming pass over x ----------------
        if two_tensorcores and N >= 2:
            # Keep >= 2 grid blocks so both v7x TensorCores get work.
            max_nb = min(max_nb, pl.cdiv(N, 2))
        nb = int(min(N, max_nb))
        grid_n = pl.cdiv(N, nb)                   # partial last block is fine

        block_bytes = nb * per_elem
        vmem_limit = int(min(cap - 4 * _MIB,
                             max(32 * _MIB, 4 * block_bytes + 4 * _MIB)))

        cost = pl.CostEstimate(
            flops=int(2 * N * C * Cr * 2),                   # two tiny SE matmuls
            transcendentals=int(N * C),                      # sigmoid
            bytes_accessed=int(2 * N * C * HW * itemsize),   # 1 read + 1 write of x
        )

        out = pl.pallas_call(
            functools.partial(_ca_fused_kernel, inv_hw=1.0 / HW),
            out_shape=jax.ShapeDtypeStruct((N, C, HW), x_nchw.dtype),
            grid_spec=pltpu.PrefetchScalarGridSpec(
                num_scalar_prefetch=0,
                grid=(grid_n,),
                in_specs=[
                    pl.BlockSpec((nb, C, HW), lambda n: (n, 0, 0)),   # x slab
                    pl.BlockSpec((C, Cr), lambda n: (0, 0)),          # w1.T
                    pl.BlockSpec((1, Cr), lambda n: (0, 0)),          # b1
                    pl.BlockSpec((Cr, C), lambda n: (0, 0)),          # w2.T
                    pl.BlockSpec((1, C), lambda n: (0, 0)),           # b2
                ],
                out_specs=pl.BlockSpec((nb, C, HW), lambda n: (n, 0, 0)),
            ),
            compiler_params=pltpu.CompilerParams(
                dimension_semantics=("parallel",),
                vmem_limit_bytes=vmem_limit,
            ),
            cost_estimate=cost,
            input_output_aliases=({0: 0} if donate_x else {}),
        )(x, w1t, b1r, w2t, b2r)
        return out.reshape(N, C, H, W)

    # ------ fallback: slab too big for VMEM (e.g. v7x 64 MiB) -> two passes ---------
    chunk_cap = max(128, (budget // (4 * C * itemsize)) // 128 * 128)
    chunk = HW if HW <= chunk_cap else int(chunk_cap)      # multiple of 128, or full HW
    n_chunks = pl.cdiv(HW, chunk)
    block_bytes = C * chunk * itemsize
    vmem_limit = int(min(cap - 4 * _MIB,
                         max(32 * _MIB, 4 * block_bytes + 4 * _MIB)))

    # Pass 1: streaming per-(batch, channel) sums in f32.
    pooled = pl.pallas_call(
        functools.partial(_pool_kernel, chunk=chunk, hw=HW),
        out_shape=jax.ShapeDtypeStruct((N, C, 1), jnp.float32),
        grid_spec=pltpu.PrefetchScalarGridSpec(
            num_scalar_prefetch=0,
            grid=(N, n_chunks),
            in_specs=[pl.BlockSpec((1, C, chunk), lambda n, s: (n, 0, s))],
            out_specs=pl.BlockSpec((1, C, 1), lambda n, s: (n, 0, 0)),
        ),
        compiler_params=pltpu.CompilerParams(
            dimension_semantics=("parallel", "arbitrary"),
            vmem_limit_bytes=vmem_limit,
        ),
        cost_estimate=pl.CostEstimate(
            flops=int(N * C * HW),
            transcendentals=0,
            bytes_accessed=int(N * C * HW * itemsize),
        ),
    )(x)

    # Tiny squeeze-excite gate in plain JAX (negligible vs the streaming passes).
    pooled = pooled.reshape(N, C) * (1.0 / HW)
    h = jnp.maximum(jnp.dot(pooled, w1t, preferred_element_type=jnp.float32) + b1r, 0.0)
    gate = jax.nn.sigmoid(jnp.dot(h, w2t, preferred_element_type=jnp.float32) + b2r)
    gate = gate.reshape(N, C, 1)

    # Pass 2: stream x again and apply the gate.
    out = pl.pallas_call(
        _scale_kernel,
        out_shape=jax.ShapeDtypeStruct((N, C, HW), x_nchw.dtype),
        grid_spec=pltpu.PrefetchScalarGridSpec(
            num_scalar_prefetch=0,
            grid=(N, n_chunks),
            in_specs=[
                pl.BlockSpec((1, C, chunk), lambda n, s: (n, 0, s)),
                pl.BlockSpec((1, C, 1), lambda n, s: (n, 0, 0)),
            ],
            out_specs=pl.BlockSpec((1, C, chunk), lambda n, s: (n, 0, s)),
        ),
        compiler_params=pltpu.CompilerParams(
            dimension_semantics=("parallel", "parallel"),
            vmem_limit_bytes=vmem_limit,
        ),
        cost_estimate=pl.CostEstimate(
            flops=int(N * C * HW),
            transcendentals=0,
            bytes_accessed=int(2 * N * C * HW * itemsize),
        ),
        input_output_aliases=({0: 0} if donate_x else {}),
    )(x, gate)
    return out.reshape(N, C, H, W)


def ca_layer_ref(x_nchw, w1, b1, w2, b2):
    """Pure-JAX reference mirroring the PyTorch forward."""
    pooled = jnp.mean(x_nchw, axis=(2, 3))                          # (N, C)
    h = jnp.maximum(pooled @ w1.T + b1.reshape(1, -1), 0.0)         # (N, Cr)
    y = jax.nn.sigmoid(h @ w2.T + b2.reshape(1, -1))                # (N, C)
    return x_nchw * y[:, :, None, None]


if __name__ == "__main__":
    key = jax.random.PRNGKey(0)
    kx, k1, k2, k3, k4 = jax.random.split(key, 5)

    # Module config: channel=64, reduction=16 -> hidden = 4.
    C = 64
    reduction = 16
    Cr = C // reduction
    w1 = jax.random.normal(k1, (Cr, C), dtype=jnp.float32) * 0.1
    b1 = jax.random.normal(k2, (Cr,), dtype=jnp.float32) * 0.1
    w2 = jax.random.normal(k3, (C, Cr), dtype=jnp.float32) * 0.1
    b2 = jax.random.normal(k4, (C,), dtype=jnp.float32) * 0.1

    # 1) Fast path, lane-dense spatial axis (HW = 256 is a multiple of 128).
    x = jax.random.normal(kx, (4, C, 16, 16), dtype=jnp.float32)
    out = jax.block_until_ready(ca_layer(x, w1, b1, w2, b2))
    ref = ca_layer_ref(x, w1, b1, w2, b2)
    assert out.shape == x.shape
    assert jnp.allclose(out, ref, atol=1e-5, rtol=1e-5), "mismatch (fast path, dense HW)"

    # 2) Fast path, HW not a multiple of 128 and N not divisible by nb
    #    (full-HW block exemption + partial last batch block via cdiv grid).
    x = jax.random.normal(kx, (3, C, 10, 10), dtype=jnp.float32)
    out = jax.block_until_ready(
        ca_layer(x, w1, b1, w2, b2, vmem_budget_bytes=250_000))
    ref = ca_layer_ref(x, w1, b1, w2, b2)
    assert jnp.allclose(out, ref, atol=1e-5, rtol=1e-5), "mismatch (fast path, ragged)"

    # 3) Forced fallback path (slab > budget): spatial-chunked two-pass scheme
    #    with a masked tail (HW = 300 is not a multiple of the 128-wide chunk).
    x = jax.random.normal(kx, (2, C, 10, 30), dtype=jnp.float32)
    out = jax.block_until_ready(
        ca_layer(x, w1, b1, w2, b2, vmem_budget_bytes=150_000))
    ref = ca_layer_ref(x, w1, b1, w2, b2)
    assert jnp.allclose(out, ref, atol=1e-5, rtol=1e-5), "mismatch (fallback path)"

    print("KERNEL_OK")
</pallas_src>

<mosaic_0001>
module attributes {stable_mosaic.version = 11 : i64} {
  func.func @_ca_fused_kernel(%arg0: i32, %arg1: memref<2x64x256xf32, #tpu.memory_space<vmem>>, %arg2: memref<64x4xf32, #tpu.memory_space<vmem>>, %arg3: memref<1x4xf32, #tpu.memory_space<vmem>>, %arg4: memref<4x64xf32, #tpu.memory_space<vmem>>, %arg5: memref<1x64xf32, #tpu.memory_space<vmem>>, %arg6: memref<2x64x256xf32, #tpu.memory_space<vmem>>) attributes {dimension_semantics = [#tpu.dimension_semantics<parallel>], iteration_bounds = array<i64: 2>, scalar_prefetch = 0 : i64, scratch_operands = 0 : i64, tpu.core_type = #tpu.core_type<tc>, window_params = [{transform_indices = @transform_0, window_bounds = array<i64: 2, 64, 256>}, {pipeline_mode = #tpu.pipeline_mode<synchronous>, transform_indices = @transform_1, window_bounds = array<i64: 64, 4>}, {pipeline_mode = #tpu.pipeline_mode<synchronous>, transform_indices = @transform_2, window_bounds = array<i64: 1, 4>}, {pipeline_mode = #tpu.pipeline_mode<synchronous>, transform_indices = @transform_3, window_bounds = array<i64: 4, 64>}, {pipeline_mode = #tpu.pipeline_mode<synchronous>, transform_indices = @transform_4, window_bounds = array<i64: 1, 64>}, {transform_indices = @transform_5, window_bounds = array<i64: 2, 64, 256>}]} {
    %c0 = arith.constant 0 : index
    %c0_0 = arith.constant 0 : index
    %c0_1 = arith.constant 0 : index
    %0 = vector.load %arg1[%c0, %c0_0, %c0_1] : memref<2x64x256xf32, #tpu.memory_space<vmem>>, vector<2x64x256xf32>
    %cst = arith.constant dense<0.000000e+00> : vector<2x64xf32>
    %1 = vector.multi_reduction <add>, %0, %cst [2] : vector<2x64x256xf32> to vector<2x64xf32>
    %cst_2 = arith.constant 3.906250e-03 : f32
    %2 = vector.broadcast %cst_2 : f32 to vector<2x64xf32>
    %3 = arith.mulf %1, %2 : vector<2x64xf32>
    %c0_3 = arith.constant 0 : index
    %c0_4 = arith.constant 0 : index
    %4 = vector.load %arg2[%c0_3, %c0_4] : memref<64x4xf32, #tpu.memory_space<vmem>>, vector<64x4xf32>
    %cst_5 = arith.constant dense<0.000000e+00> : vector<2x4xf32>
    %5 = tpu.matmul %3, %4, %cst_5 {dimension_numbers = #tpu.dot_dimension_numbers<[1], [0], [0], [1], [0, 0, 1, 1], [], []>} : vector<2x64xf32>, vector<64x4xf32>, vector<2x4xf32> -> vector<2x4xf32>
    %c0_6 = arith.constant 0 : index
    %c0_7 = arith.constant 0 : index
    %6 = vector.load %arg3[%c0_6, %c0_7] : memref<1x4xf32, #tpu.memory_space<vmem>>, vector<1x4xf32>
    %7 = vector.broadcast %6 : vector<1x4xf32> to vector<2x4xf32>
    %8 = arith.addf %5, %7 : vector<2x4xf32>
    %cst_8 = arith.constant 0.000000e+00 : f32
    %9 = vector.broadcast %cst_8 : f32 to vector<2x4xf32>
    %10 = arith.maximumf %8, %9 : vector<2x4xf32>
    %c0_9 = arith.constant 0 : index
    %c0_10 = arith.constant 0 : index
    %11 = vector.load %arg4[%c0_9, %c0_10] : memref<4x64xf32, #tpu.memory_space<vmem>>, vector<4x64xf32>
    %cst_11 = arith.constant dense<0.000000e+00> : vector<2x64xf32>
    %12 = tpu.matmul %10, %11, %cst_11 {dimension_numbers = #tpu.dot_dimension_numbers<[1], [0], [0], [1], [0, 0, 1, 1], [], []>} : vector<2x4xf32>, vector<4x64xf32>, vector<2x64xf32> -> vector<2x64xf32>
    %c0_12 = arith.constant 0 : index
    %c0_13 = arith.constant 0 : index
    %13 = vector.load %arg5[%c0_12, %c0_13] : memref<1x64xf32, #tpu.memory_space<vmem>>, vector<1x64xf32>
    %14 = vector.broadcast %13 : vector<1x64xf32> to vector<2x64xf32>
    %15 = arith.addf %12, %14 : vector<2x64xf32>
    %16 = arith.negf %15 : vector<2x64xf32>
    %17 = math.exp %16 : vector<2x64xf32>
    %cst_14 = arith.constant 1.000000e+00 : f32
    %18 = vector.broadcast %cst_14 : f32 to vector<2x64xf32>
    %19 = arith.addf %18, %17 : vector<2x64xf32>
    %20 = arith.divf %18, %19 : vector<2x64xf32>
    %21 = vector.shape_cast %20 : vector<2x64xf32> to vector<2x64x1xf32>
    %22 = vector.broadcast %21 : vector<2x64x1xf32> to vector<2x64x256xf32>
    %23 = arith.mulf %0, %22 : vector<2x64x256xf32>
    %c0_15 = arith.constant 0 : index
    %c0_16 = arith.constant 0 : index
    %c0_17 = arith.constant 0 : index
    %24 = vector.load %arg6[%c0_15, %c0_16, %c0_17] : memref<2x64x256xf32, #tpu.memory_space<vmem>>, vector<2x64x256xf32>
    tpu.vector_store %arg6[%c0_15, %c0_16, %c0_17], %23 {strides = array<i32>} : memref<2x64x256xf32, #tpu.memory_space<vmem>>, vector<2x64x256xf32>,
    return
  }
  func.func @transform_0(%arg0: i32) -> (i32, i32, i32) {
    %c0_i32 = arith.constant 0 : i32
    %c0_i32_0 = arith.constant 0 : i32
    %c0_i32_1 = arith.constant 0 : i32
    return %arg0, %c0_i32, %c0_i32_0 : i32, i32, i32
  }
  func.func @transform_1(%arg0: i32) -> (i32, i32) {
    %c0_i32 = arith.constant 0 : i32
    %c0_i32_0 = arith.constant 0 : i32
    %c0_i32_1 = arith.constant 0 : i32
    return %c0_i32, %c0_i32_0 : i32, i32
  }
  func.func @transform_2(%arg0: i32) -> (i32, i32) {
    %c0_i32 = arith.constant 0 : i32
    %c0_i32_0 = arith.constant 0 : i32
    %c0_i32_1 = arith.constant 0 : i32
    return %c0_i32, %c0_i32_0 : i32, i32
  }
  func.func @transform_3(%arg0: i32) -> (i32, i32) {
    %c0_i32 = arith.constant 0 : i32
    %c0_i32_0 = arith.constant 0 : i32
    %c0_i32_1 = arith.constant 0 : i32
    return %c0_i32, %c0_i32_0 : i32, i32
  }
  func.func @transform_4(%arg0: i32) -> (i32, i32) {
    %c0_i32 = arith.constant 0 : i32
    %c0_i32_0 = arith.constant 0 : i32
    %c0_i32_1 = arith.constant 0 : i32
    return %c0_i32, %c0_i32_0 : i32, i32
  }
  func.func @transform_5(%arg0: i32) -> (i32, i32, i32) {
    %c0_i32 = arith.constant 0 : i32
    %c0_i32_0 = arith.constant 0 : i32
    %c0_i32_1 = arith.constant 0 : i32
    return %arg0, %c0_i32, %c0_i32_0 : i32, i32, i32
  }
}

</mosaic_0001>

<bundles_post_ra>
// kernel: tpu_custom_call.1
= control target key start
LH: loop header
LB: loop body
LE: loop exit
PB: predicated region body
PF: predicated region fallthrough
CT: control target
= control target key end

     0   :  { %10 = vsyncpa [#allocation3], 0  ;;  %s1544_s0 = inlined_call_operand.hbm [shape: f32[4,64,256], index: 0, kind: input, shape index: {}]   ;;  %s1545_s1 = inlined_call_operand.vmem [shape: f32[64,4], index: 1, kind: input, shape index: {}]   ;;  %s1546_s2 = inlined_call_operand.vmem [shape: f32[1,4], index: 2, kind: input, shape index: {}]   ;;  %s1547_s3 = inlined_call_operand.vmem [shape: f32[4,64], index: 3, kind: input, shape index: {}]   ;;  %s1548_s4 = inlined_call_operand.vmem [shape: f32[1,64], index: 4, kind: input, shape index: {}]   ;;  %s1549_s5 = inlined_call_operand.hbm [shape: f32[4,64,256], index: 5, kind: output, shape index: {}]  }
   0x1   :  { %12 = vsyncpa [#allocation3 + $0x1], 0 }
   0x2   :  { %13 = vsyncpa [#allocation4], 0 }
   0x3   :  { %15 = vsyncpa [#allocation4 + $0x1], 0  ;;  %s1124_s18 = smov 0   ;;  %s1126_s19 = smov 0  }
   0x4   :  { %s1128_s20 = smov 0   ;;  %s1130_s21 = smov 0  }
   0x5 LB: > { %s1145_s22 = sadd.s32 4294967295, %s1083_s21   ;;  %s857_s23 = sadd.s32 4294967294, %s1083_s21   ;;  %s1083_s21 = sphi %s1130_s21, %s1583_s21   ;;  %s1079_s20 = sphi %s1128_s20, %s1582_s20   ;;  %s1075_s19 = sphi %s1126_s19, %s1581_s19   ;;  %s1071_s18 = sphi %s1124_s18, %s1580_s18  }
   0x6   : > { %s1149_s24 = sadd.s32 1, %s1083_s21   ;;  %s28_s25 = sadd.s32 1, %s1079_s20 }
   0x7   : > { %s25_s26 = ssub.s32 %s1083_s21, %s1149_s24  ;;  %p35_p0 = scmp.ne.s32.totalorder %s1079_s20, %s1075_s19 }
   0x8   : > { %p26_p1 = scmp.eq.s32.totalorder %s25_s26, 0  ;;  %p36_p2 = scmp.eq.s32.totalorder %s1083_s21, 0 }
   0x9   : > { %p41_p3 = scmp.ne.s32.totalorder %s1075_s19, %s1071_s18  ;;  %p42_p4 = scmp.eq.s32.totalorder %s1145_s22, 0 }
   0xa   : > { %s1161_s27 = scalar_select %p26_p1, %s1079_s20, %s28_s25  }
   0xb   : > { %p1163_p5 = por %p36_p2, %p35_p0  ;;  %p1167_p6 = por %p42_p4, %p41_p3 }
   0xc   : > { %p149_p7 = scmp.eq.s32.totalorder %s1145_s22, 1  ;;  %p155_p8 = scmp.eq.s32.totalorder %s857_s23, 1 }
   0xd   : > { %p942_p10 = scmp.lt.s32.totalorder %s1083_s21, 2  ;;  %s187_s7 = sand.u32 1, %s1079_s20  }
   0xe   : > { %p1174_p11 = por %p149_p7, %p35_p0  ;;  %p1178_p12 = por %p155_p8, %p41_p3 }
   0xf   : > { %s880_s8 = sshll.u32 %s1083_s21, 12  ;;  %s860_s9 = sshll.u32 %s187_s7, 8 }
  0x10   : > { %s1560_s30 = scalar_select %p1174_p11, 1, 0 }
  0x11   : > { %s1561_s6 = scalar_select %p1178_p12, 1, 0 }
  0x12   : > { %s1187_s12 = scalar_lea.hbm %s1544_s0, %s880_s8  ;;  %s191_s13 = scalar_lea.vmem [#allocation2], %s860_s9 }
  0x13   : > { %s199_s14 = sshll.u32 %s191_s13, 4  ;;  %p1191_p13 = pnand %p942_p10, %p1163_p5  ;;  %s1195_s14 = int_to_ptr.vmem [resolvable:$true] %s199_s14 }
  0x14   : > { %s1197_s16 = scalar_lea.sflag [#allocation3], %s187_s7  ;;  %s987_s17 = scalar_lea.hbm %s1187_s12, 4096 }
  0x15   : > { %p988_p0 = scmp.ne.s32.totalorder %s1187_s12, %s987_s17  ;;  %p989_p1 = pneg %p1191_p13 }
  0x16   : > { %s992_s26 = scalar_lea.hbm %s1544_s0, 8192  ;;  %p993_p4 = scmp.lt.u32.totalorder %s1187_s12, %s1544_s0 }
  0x17   : > { %p990_p2 = pnand %p989_p1, %p988_p0  ;;  %p994_p5 = scmp.lt.u32.totalorder %s992_s26, %s987_s17 }
  0x18   : > { %p996_p8 = scmp.lt.u32.totalorder %s987_s17, %s1187_s12 }
  0x19   : > { %p991_p3 = pneg %p990_p2  ;;  %p995_p7 = por %p994_p5, %p993_p4 }
  0x1b   : > { %p997_p10 = por %p996_p8, %p995_p7 }
  0x1d   : > { %p998_p9 = pnand %p997_p10, %p991_p3 }
  0x1f   : > { %1001 = shalt.err (!%p998_p9)
}
  0x20   : > { %s1002_s7 = scalar_lea.vmem %s1195_s14, 4096  ;;  %s1085_s9 = smov [#allocation2]  }
  0x21   : > { %p1003_p0 = scmp.ne.s32.totalorder %s1195_s14, %s1002_s7  ;;  %s1007_s10 = sshll.u32 %s1085_s9, 4  ;;  %s1008_s10 = int_to_ptr.vmem [resolvable:$false] %s1007_s10 }
  0x22   : > { %s1009_s11 = scalar_lea.vmem %s1008_s10, 8192  ;;  %p1010_p11 = scmp.lt.s32.totalorder %s1195_s14, %s1008_s10 }
  0x23   : > { %p1005_p2 = pnand %p1003_p0, %p989_p1  ;;  %p1011_p4 = scmp.lt.s32.totalorder %s1009_s11, %s1002_s7 }
  0x25   : > { %p1006_p12 = pneg %p1005_p2  ;;  %p1012_p5 = por %p1011_p4, %p1010_p11 }
  0x27   : > { %p1013_p7 = pnand %p1012_p5, %p1006_p12 }
  0x29   : > { %1016 = shalt.err (!%p1013_p7)
}
  0x2a   : > { %s1086_s13 = smov 256   ;;  %s1087_s17 = smov 16  }
  0x2b   : > { %937 = dma.hbm_to_vmem [thread:$0]  (!%p1191_p13), %s1187_s12, 4096, %s1195_s14, %s1197_s16, %s1086_s13, %s1086_s13, %s1087_s17  }
  0x2c   : > { %p864_p9 = scmp.ge.s32.totalorder %s1083_s21, 1  ;;  %p207_p1 = scmp.lt.s32.totalorder %s1083_s21, 3 }
  0x2e   : > { %p208_p3 = pnand %p864_p9, %p207_p1 }
  0x30   : > { %211 = sbr.rel (%p208_p3) target bundleno = 861 (0x35d), region = 40 }
  0x37   : > { %s1228_s23 = sand.u32 1, %s1075_s19  }
  0x38   : > { %s865_s25 = sshll.u32 %s1228_s23, 8  ;;  %s214_s26 = scalar_lea.sflag [#allocation3], %s1228_s23 }
  0x39   : > { %s1234_s28 = scalar_lea.vmem [#allocation2], %s865_s25 }
  0x3a   : > { %1062 = dma.done.wait (%p1167_p6), %s214_s26, 4096  }
  0x3b   : > { %1064 = vsyncadd (%p1167_p6), %s214_s26, 4294963200  ;;  %v1241_v0 = vld [vmem:[%s1234_s28 + $0x80] sm:$0xff]  ;;  %v1244_v1 = vld [vmem:[%s1234_s28 + $0x88] sm:$0xff]  ;;  %v1088_v51 = vmov 0.0|0.0   ;;  %vm1089_vm0 = vmmov 0   ;;  %v1090_v61 = vmov 0.0  }
  0x3c   : > { %v1247_v2 = vld [vmem:[%s1234_s28] sm:$0xff]  ;;  %v302_v3 = vadd.f32 %v1244_v1, %v1241_v0  ;;  %v1252_v4 = vld [vmem:[%s1234_s28 + $0x8] sm:$0xff]  ;;  %v1255_v5 = vld [vmem:[%s1234_s28 + $0x90] sm:$0xff]  ;;  %918 = vmatprep.subr.bf16.mxu0 %v1088_v51  ;;  %910 = vmatprep.mubr.msk.f32.mxu0 %vm1089_vm0, %v1090_v61  ;;  %vm384_vm1 = vcmask 130112   ;;  %vm391_vm2 = vcmask 195712   ;;  %vm398_vm3 = vcmask 261312  }
  0x3d   : > { %v1258_v6 = vld [vmem:[%s1234_s28 + $0x98] sm:$0xff]  ;;  %v278_v7 = vadd.f32 %v1252_v4, %v1247_v2  ;;  %v1263_v8 = vld [vmem:[%s1234_s28 + $0x10] sm:$0xff]  ;;  %v1273_v12 = vld [vmem:[%s1234_s28 + $0xa0] sm:$0xff]  ;;  %913 = vmatprep.subr.mxu1 %v1090_v61  ;;  %915 = vmatprep.mubr.msk.f32.mxu1 %vm1089_vm0, %v1090_v61  ;;  %vm405_vm4 = vcmask 326912   ;;  %vm412_vm5 = vcmask 392512   ;;  %vm419_vm6 = vcmask 458112  }
  0x3e   : > { %v1266_v9 = vld [vmem:[%s1234_s28 + $0x18] sm:$0xff]  ;;  %303 = vadd.xlane.f32.xlu1 %v302_v3  ;;  %v305_v10 = vadd.f32 %v1258_v6, %v1255_v5  ;;  %v1276_v13 = vld [vmem:[%s1234_s28 + $0xa8] sm:$0xff]  ;;  %v1279_v14 = vld [vmem:[%s1234_s28 + $0x20] sm:$0xff]  ;;  %vm426_vm7 = vcmask 523712   ;;  %vm467_vm8 = vcmask 1041409   ;;  %vm469_vm9 = vcmask 523264  }
  0x3f   : > { %279 = vadd.xlane.f32.xlu0 %v278_v7  ;;  %v281_v11 = vadd.f32 %v1266_v9, %v1263_v8  ;;  %v1282_v15 = vld [vmem:[%s1234_s28 + $0x28] sm:$0xff]  ;;  %v308_v16 = vadd.f32 %v1276_v13, %v1273_v12  ;;  %v1289_v18 = vld [vmem:[%s1234_s28 + $0xb0] sm:$0xff]  ;;  %v1292_v19 = vld [vmem:[%s1234_s28 + $0xb8] sm:$0xff]  ;;  %vm555_vm10 = vcmask 1043456   ;;  %vm551_vm11 = vcmask 31744   ;;  %s1431_s10 = scalar_lea.vmem [#allocation5], %s865_s25 }
  0x40   : > { %v284_v17 = vadd.f32 %v1282_v15, %v1279_v14  ;;  %1563 = vst [vmem:[#allocation8_spill] sm:$0xff] %v1292_v19  ;;  %v1295_v20 = vld [vmem:[%s1234_s28 + $0x30] sm:$0xff]  ;;  %v1298_v21 = vld [vmem:[%s1234_s28 + $0x38] sm:$0xff]  ;;  %v311_v22 = vadd.f32 %v1292_v19, %v1289_v18  ;;  %v1305_v24 = vld [vmem:[%s1234_s28 + $0xc0] sm:$0xff]  ;;  %s882_s25 = sshll.u32 %s1145_s22, 12  ;;  %s784_s11 = sshll.u32 %s1431_s10, 4  ;;  %s1496_s11 = int_to_ptr.vmem [resolvable:$true] %s784_s11 }
  0x41   : > { %v287_v23 = vadd.f32 %v1298_v21, %v1295_v20  ;;  %v1308_v25 = vld [vmem:[%s1234_s28 + $0xc8] sm:$0xff]  ;;  %v1311_v26 = vld [vmem:[%s1234_s28 + $0x40] sm:$0xff]  ;;  %v1321_v30 = vld [vmem:[%s1234_s28 + $0xd0] sm:$0xff]  ;;  %s1494_s26 = scalar_lea.hbm %s1549_s5, %s882_s25  ;;  %s770_s22 = scalar_lea.sflag [#allocation4], %s1228_s23 }
  0x42   : > { %306 = vadd.xlane.f32.xlu1 %v305_v10  ;;  %v1314_v27 = vld [vmem:[%s1234_s28 + $0x48] sm:$0xff]  ;;  %v314_v28 = vadd.f32 %v1308_v25, %v1305_v24  ;;  %1564 = vst [vmem:[#allocation9_spill] sm:$0xff] %v1321_v30  ;;  %v1324_v31 = vld [vmem:[%s1234_s28 + $0xd8] sm:$0xff]  ;;  %v1327_v32 = vld [vmem:[%s1234_s28 + $0x50] sm:$0xff]  ;;  %v373_v10 = vlaneseq  ;;  %p1577_p11 = scmp.ne.s32.totalorder %s1560_s30, 0  ;;  %s1091_s29 = smov [#allocation5]  }
  0x43   : > { %282 = vadd.xlane.f32.xlu0 %v281_v11  ;;  %v290_v29 = vadd.f32 %v1314_v27, %v1311_v26  ;;  %1565 = vst [vmem:[#allocation10_spill] sm:$0xff] %v1324_v31  ;;  %v1330_v33 = vld [vmem:[%s1234_s28 + $0x58] sm:$0xff]  ;;  %v317_v34 = vadd.f32 %v1324_v31, %v1321_v30  ;;  %v1337_v36 = vld [vmem:[%s1234_s28 + $0xe0] sm:$0xff]  ;;  %v1340_v37 = vld [vmem:[%s1234_s28 + $0xe8] sm:$0xff]  ;;  %s1021_s12 = sshll.u32 %s1091_s29, 4  ;;  %s1022_s12 = int_to_ptr.vmem [resolvable:$false] %s1021_s12 }
  0x44   : > { %v293_v35 = vadd.f32 %v1330_v33, %v1327_v32  ;;  %1566 = vst [vmem:[#allocation11_spill] sm:$0xff] %v1337_v36  ;;  %1567 = vst [vmem:[#allocation12_spill] sm:$0xff] %v1340_v37  ;;  %v1343_v38 = vld [vmem:[%s1234_s28 + $0x60] sm:$0xff]  ;;  %v1346_v39 = vld [vmem:[%s1234_s28 + $0x68] sm:$0xff]  ;;  %v320_v40 = vadd.f32 %v1340_v37, %v1337_v36  ;;  %s1023_s14 = scalar_lea.vmem %s1022_s12, 8192  ;;  %p1024_p8 = scmp.lt.s32.totalorder %s1496_s11, %s1022_s12 }
  0x45   : > { %v296_v41 = vadd.f32 %v1346_v39, %v1343_v38  ;;  %v1353_v42 = vld [vmem:[%s1234_s28 + $0xf0] sm:$0xff]  ;;  %v1356_v43 = vld [vmem:[%s1234_s28 + $0xf8] sm:$0xff]  ;;  %v342_v48 = vld [vmem:[%s1545_s1] sm:$0xff] }
  0x46   : > { %309 = vadd.xlane.f32.xlu1 %v308_v16  ;;  %1568 = vst [vmem:[#allocation13_spill] sm:$0xff] %v1353_v42  ;;  %1569 = vst [vmem:[#allocation14_spill] sm:$0xff] %v1356_v43  ;;  %v1359_v44 = vld [vmem:[%s1234_s28 + $0x70] sm:$0xff]  ;;  %v1362_v45 = vld [vmem:[%s1234_s28 + $0x78] sm:$0xff]  ;;  %v323_v46 = vadd.f32 %v1356_v43, %v1353_v42  ;;  %s1017_s28 = scalar_lea.vmem %s1496_s11, 4096 }
  0x47   : > { %285 = vadd.xlane.f32.xlu0 %v284_v17  ;;  %v299_v47 = vadd.f32 %v1362_v45, %v1359_v44  ;;  %v343_v49 = vld [vmem:[%s1545_s1 + $0x8] sm:$0xff]  ;;  %v344_v52 = vld [vmem:[%s1545_s1 + $0x10] sm:$0xff]  ;;  %v345_v53 = vld [vmem:[%s1545_s1 + $0x18] sm:$0xff]  ;;  %v374_v17 = vand.u32 127, %v373_v10  ;;  %p1018_p6 = scmp.ne.s32.totalorder %s1496_s11, %s1017_s28  ;;  %p1025_p10 = scmp.lt.s32.totalorder %s1023_s14, %s1017_s28 }
  0x48   : > { %v919_v50 = vpack.c.bf16 %v343_v49, %v342_v48  ;;  %v922_v54 = vpack.c.bf16 %v345_v53, %v344_v52  ;;  %v346_v55 = vld [vmem:[%s1545_s1 + $0x20] sm:$0xff]  ;;  %v347_v56 = vld [vmem:[%s1545_s1 + $0x28] sm:$0xff]  ;;  %v348_v58 = vld [vmem:[%s1545_s1 + $0x30] sm:$0xff] }
  0x49   : > { %v925_v57 = vpack.c.bf16 %v347_v56, %v346_v55  ;;  %v349_v59 = vld [vmem:[%s1545_s1 + $0x38] sm:$0xff]  ;;  %p1019_p12 = pnand %p1018_p6, %p1577_p11  ;;  %p1026_p0 = por %p1025_p10, %p1024_p8 }
  0x4a   : > { %312 = vadd.xlane.f32.xlu1 %v311_v22  ;;  %920 = vmatpush3.bf16.msra.mxu0 %v919_v50  ;;  %v928_v60 = vpack.c.bf16 %v349_v59, %v348_v58 }
  0x4b   : > { %288 = vadd.xlane.f32.xlu0 %v287_v23  ;;  %921 = vmatprep.subr.bf16.mxu0 %v1088_v51  ;;  %v1392_v23 = vshrl.u32 %v373_v10, 7  ;;  %p1020_p13 = pneg %p1019_p12 }
  0x4d   : > { %p1027_p2 = pnand %p1026_p0, %p1020_p13 }
  0x4e   : > { %315 = vadd.xlane.f32.xlu1 %v314_v28  ;;  %923 = vmatpush3.bf16.msra.mxu0 %v922_v54 }
  0x4f   : > { %291 = vadd.xlane.f32.xlu0 %v290_v29  ;;  %924 = vmatprep.subr.bf16.mxu0 %v1088_v51  ;;  %v379_v29 = vadd.s32 4294967288, %v374_v17 }
  0x51   : > { %v382_v49 = vsub.s32 %v379_v29, %v1392_v23 }
  0x52   : > { %318 = vadd.xlane.f32.xlu1 %v317_v34  ;;  %926 = vmatpush3.bf16.msra.mxu0 %v925_v57  ;;  %v386_v34 = vadd.s32 4294967280, %v374_v17 }
  0x53   : > { %294 = vadd.xlane.f32.xlu0 %v293_v35  ;;  %927 = vmatprep.subr.bf16.mxu0 %v1088_v51  ;;  %v393_v35 = vadd.s32 4294967272, %v374_v17  ;;  %v414_v51 = vadd.s32 4294967248, %v374_v17 }
  0x54   : > { %v389_v50 = vsub.s32 %v386_v34, %v1392_v23 }
  0x55   : > { %v396_v53 = vsub.s32 %v393_v35, %v1392_v23 }
  0x56   : > { %321 = vadd.xlane.f32.xlu1 %v320_v40  ;;  %929 = vmatpush3.bf16.msra.mxu0 %v928_v60  ;;  %v400_v40 = vadd.s32 4294967264, %v374_v17 }
  0x57   : > { %297 = vadd.xlane.f32.xlu0 %v296_v41 }
  0x58   : > { %v403_v54 = vsub.s32 %v400_v40, %v1392_v23  ;;  %v421_v40 = vadd.s32 4294967240, %v374_v17 }
  0x5a   : > { %324 = vadd.xlane.f32.xlu1 %v323_v46  ;;  %v407_v46 = vadd.s32 4294967256, %v374_v17 }
  0x5b   : > { %300 = vadd.xlane.f32.xlu0 %v299_v47  ;;  %v377_v47 = vsub.s32 %v374_v17, %v1392_v23  ;;  %v424_v17 = vsub.s32 %v421_v40, %v1392_v23  ;;  %v867_v40 = vld [vmem:[%s1546_s2] ss:$0 sm:$0xff] }
  0x5c   : > { %v410_v57 = vsub.s32 %v407_v46, %v1392_v23 }
  0xcb   : > { %v304_v62 = vpop.xlane.xlu1 %303 }
  0xcc   : > { %v280_v63 = vpop.xlane.xlu0 %279  ;;  %v334_v59 = vmul.f32 0.00390625, %v304_v62 }
  0xcd   : > { %v326_v29 = vmul.f32 0.00390625, %v280_v63 }
  0xce   : > { %v431_v37 = vrot.slane %v334_v59, %v377_v47 }
  0xcf   : > { %v307_v3 = vpop.xlane.xlu1 %306  ;;  %v378_v19 = vrot.slane %v326_v29, %v377_v47 }
  0xd0   : > { %v283_v7 = vpop.xlane.xlu0 %282  ;;  %v335_v52 = vmul.f32 0.00390625, %v307_v3  ;;  %v417_v3 = vsub.s32 %v414_v51, %v1392_v23 }
  0xd1   : > { %v327_v55 = vmul.f32 0.00390625, %v283_v7 }
  0xd2   : > { %v435_v35 = vrot.slane %v335_v52, %v382_v49 }
  0xd3   : > { %v310_v11 = vpop.xlane.xlu1 %309  ;;  %v383_v7 = vrot.slane %v327_v55, %v382_v49 }
  0xd4   : > { %v286_v16 = vpop.xlane.xlu0 %285  ;;  %v336_v56 = vmul.f32 0.00390625, %v310_v11  ;;  %v436_v51 = vsel %vm384_vm1, %v435_v35, %v431_v37  ;;  %v543_v35 = vld [vmem:[%s1547_s3] sm:$0xf] }
  0xd5   : > { %v328_v60 = vmul.f32 0.00390625, %v286_v16  ;;  %v385_v49 = vsel %vm384_vm1, %v383_v7, %v378_v19  ;;  %914 = vmatpush3.msk.msra.mxu1 %vm555_vm10, %v543_v35  ;;  %v1572_v35 = vld [vmem:[#allocation12_spill] sm:$0xff] }
  0xd6   : > { %v440_v11 = vrot.slane %v336_v56, %v389_v50 }
  0xd7   : > { %v313_v22 = vpop.xlane.xlu1 %312  ;;  %v390_v62 = vrot.slane %v328_v60, %v389_v50 }
  0xd8   : > { %v289_v28 = vpop.xlane.xlu0 %288  ;;  %v337_v61 = vmul.f32 0.00390625, %v313_v22  ;;  %v441_v55 = vsel %vm391_vm2, %v440_v11, %v436_v51 }
  0xd9   : > { %v329_v34 = vmul.f32 0.00390625, %v289_v28  ;;  %v392_v59 = vsel %vm391_vm2, %v390_v62, %v385_v49 }
  0xda   : > { %v445_v16 = vrot.slane %v337_v61, %v396_v53 }
  0xdb   : > { %v316_v41 = vpop.xlane.xlu1 %315  ;;  %v397_v63 = vrot.slane %v329_v34, %v396_v53 }
  0xdc   : > { %v292_v48 = vpop.xlane.xlu0 %291  ;;  %v338_v43 = vmul.f32 0.00390625, %v316_v41  ;;  %v446_v47 = vsel %vm398_vm3, %v445_v16, %v441_v55  ;;  %v869_v16 = vld [vmem:[%s1548_s4] ss:$0 sm:$0xff]  ;;  %v672_v55 = vsub.s32 1, %v1392_v23 }
  0xdd   : > { %v330_v42 = vmul.f32 0.00390625, %v292_v48  ;;  %v399_v37 = vsel %vm398_vm3, %v397_v63, %v392_v59 }
  0xde   : > { %v450_v28 = vrot.slane %v338_v43, %v403_v54 }
  0xdf   : > { %v319_v58 = vpop.xlane.xlu1 %318  ;;  %v404_v52 = vrot.slane %v330_v42, %v403_v54 }
  0xe0   : > { %v295_v10 = vpop.xlane.xlu0 %294  ;;  %v339_v31 = vmul.f32 0.00390625, %v319_v58 }
  0xe1   : > { %v331_v30 = vmul.f32 0.00390625, %v295_v10  ;;  %v406_v19 = vsel %vm405_vm4, %v404_v52, %v399_v37 }
  0xe2   : > { %v455_v48 = vrot.slane %v339_v31, %v410_v57  ;;  %v451_v31 = vsel %vm405_vm4, %v450_v28, %v446_v47 }
  0xe3   : > { %v322_v46 = vpop.xlane.xlu1 %321  ;;  %v411_v56 = vrot.slane %v331_v30, %v410_v57 }
  0xe4   : > { %v340_v22 = vmul.f32 0.00390625, %v322_v46  ;;  %v298_v36 = vpop.xlane.xlu0 %297  ;;  %v456_v54 = vsel %vm412_vm5, %v455_v48, %v451_v31  ;;  %v637_v48 = vsub.s32 0, %v1392_v23 }
  0xe5   : > { %v332_v41 = vmul.f32 0.00390625, %v298_v36  ;;  %v413_v57 = vsel %vm412_vm5, %v411_v56, %v406_v19 }
  0xe6   : > { %v460_v58 = vrot.slane %v340_v22, %v417_v3 }
  0xe7   : > { %v325_v50 = vpop.xlane.xlu1 %324  ;;  %v418_v53 = vrot.slane %v332_v41, %v417_v3 }
  0xe8   : > { %v341_v43 = vmul.f32 0.00390625, %v325_v50  ;;  %v301_v36 = vpop.xlane.xlu0 %300  ;;  %v461_v60 = vsel %vm419_vm6, %v460_v58, %v456_v54 }
  0xe9   : > { %v333_v42 = vmul.f32 0.00390625, %v301_v36  ;;  %v420_v10 = vsel %vm419_vm6, %v418_v53, %v413_v57 }
  0xea   : > { %v465_v30 = vrot.slane %v341_v43, %v424_v17 }
  0xeb   : > { %v425_v61 = vrot.slane %v333_v42, %v424_v17 }
  0xec   : > { %v466_v29 = vsel %vm426_vm7, %v465_v30, %v461_v60 }
  0xed   : > { %v427_v34 = vsel %vm426_vm7, %v425_v61, %v420_v10 }
  0xee   : > { %v468_v3 = vsel %vm467_vm8, %v466_v29, %v427_v34  ;;  %v1570_v29 = vld [vmem:[#allocation8_spill] sm:$0xff] }
  0xef   : > { %911 = vmatmul.mubr.msk.f32.vlgmr.msra.gmra.mrb[0].mxu0 %vm469_vm9, %v468_v3 }
 0x1c2   : > { %v538_v7 = vpop.f32.mrb[0].mxu0 }
 0x1c3   : > { %v539_v11 = vadd.f32 %v867_v40, %v538_v7  ;;  %v912_v46 = vpop.f32.mrb[1].mxu0  ;;  %v1573_v40 = vld [vmem:[#allocation9_spill] sm:$0xff] }
 0x1c5   : > { %v542_v62 = vmax.f32 %v539_v11, 0.0  ;;  %v1574_v11 = vld [vmem:[#allocation10_spill] sm:$0xff] }
 0x1c7   : > { %916 = vmatmul.mubr.msk.f32.vlgmr.msra.gmra.mrb[0].mxu1 %vm551_vm11, %v542_v62  ;;  %v1575_v62 = vld [vmem:[#allocation13_spill] sm:$0xff] }
 0x29a   : > { %v625_v22 = vpop.f32.mrb[0].mxu1 }
 0x29b   : > { %v626_v63 = vadd.f32 %v869_v16, %v625_v22  ;;  %v917_v28 = vpop.f32.mrb[1].mxu1  ;;  %v1576_v22 = vld [vmem:[#allocation14_spill] sm:$0xff] }
 0x29d   : > { %v872_v41 = vmul.f32 -1.442695, %v626_v63 }
 0x29f   : > { %983 = vpow2.f32 %v872_v41 }
 0x2a9   : > { %v984_v51 = vpop.eup %983 }
 0x2aa   : > { %v632_v52 = vadd.f32 1.0, %v984_v51 }
 0x2ac   : > { %985 = vrcp.f32 %v632_v52 }
 0x2b6   : > { %v986_v17 = vpop.eup %985 }
 0x2b7   : > { %v638_v49 = vrot.slane %v986_v17, %v637_v48  ;;  %v673_v56 = vrot.slane %v986_v17, %v672_v55 }
 0x2b9   : > { %644 = vbcast.lane.b32.xlu1 %v638_v49, 264  ;;  %640 = vbcast.lane.b32.xlu0 %v638_v49, 256 }
 0x2bd   : > { %648 = vbcast.lane.b32.xlu1 %v638_v49, 272  ;;  %656 = vbcast.lane.b32.xlu0 %v638_v49, 288 }
 0x2c1   : > { %652 = vbcast.lane.b32.xlu1 %v638_v49, 280  ;;  %664 = vbcast.lane.b32.xlu0 %v638_v49, 304 }
 0x2c5   : > { %660 = vbcast.lane.b32.xlu1 %v638_v49, 296  ;;  %675 = vbcast.lane.b32.xlu0 %v673_v56, 256 }
 0x2c9   : > { %668 = vbcast.lane.b32.xlu1 %v638_v49, 312  ;;  %683 = vbcast.lane.b32.xlu0 %v673_v56, 272 }
 0x2cd   : > { %679 = vbcast.lane.b32.xlu1 %v673_v56, 264  ;;  %691 = vbcast.lane.b32.xlu0 %v673_v56, 288 }
 0x2d1   : > { %687 = vbcast.lane.b32.xlu1 %v673_v56, 280  ;;  %699 = vbcast.lane.b32.xlu0 %v673_v56, 304 }
 0x2d5   : > { %695 = vbcast.lane.b32.xlu1 %v673_v56, 296 }
 0x2d9   : > { %703 = vbcast.lane.b32.xlu1 %v673_v56, 312 }
 0x32b   : > { %v645_v58 = vpop.permute.xlu1 %644  ;;  %v641_v50 = vpop.permute.xlu0 %640 }
 0x32c   : > { %v707_v59 = vmul.f32 %v645_v58, %v1263_v8  ;;  %v708_v23 = vmul.f32 %v645_v58, %v1266_v9  ;;  %v705_v47 = vmul.f32 %v641_v50, %v1247_v2  ;;  %v706_v53 = vmul.f32 %v641_v50, %v1252_v4 }
 0x32e   : > { %739 = vst [vmem:[%s1431_s10 + $0x10] sm:$0xff] %v707_v59  ;;  %740 = vst [vmem:[%s1431_s10 + $0x18] sm:$0xff] %v708_v23 }
 0x32f   : > { %737 = vst [vmem:[%s1431_s10] sm:$0xff] %v705_v47  ;;  %738 = vst [vmem:[%s1431_s10 + $0x8] sm:$0xff] %v706_v53  ;;  %v649_v8 = vpop.permute.xlu1 %648  ;;  %v657_v2 = vpop.permute.xlu0 %656 }
 0x330   : > { %v709_v4 = vmul.f32 %v649_v8, %v1279_v14  ;;  %v710_v9 = vmul.f32 %v649_v8, %v1282_v15  ;;  %v713_v43 = vmul.f32 %v657_v2, %v1311_v26  ;;  %v714_v36 = vmul.f32 %v657_v2, %v1314_v27 }
 0x332   : > { %741 = vst [vmem:[%s1431_s10 + $0x20] sm:$0xff] %v709_v4  ;;  %742 = vst [vmem:[%s1431_s10 + $0x28] sm:$0xff] %v710_v9 }
 0x333   : > { %745 = vst [vmem:[%s1431_s10 + $0x40] sm:$0xff] %v713_v43  ;;  %746 = vst [vmem:[%s1431_s10 + $0x48] sm:$0xff] %v714_v36  ;;  %v653_v37 = vpop.permute.xlu1 %652  ;;  %v665_v31 = vpop.permute.xlu0 %664 }
 0x334   : > { %v711_v42 = vmul.f32 %v653_v37, %v1295_v20  ;;  %v712_v14 = vmul.f32 %v653_v37, %v1298_v21  ;;  %v717_v15 = vmul.f32 %v665_v31, %v1343_v38  ;;  %v718_v26 = vmul.f32 %v665_v31, %v1346_v39 }
 0x336   : > { %743 = vst [vmem:[%s1431_s10 + $0x30] sm:$0xff] %v711_v42  ;;  %744 = vst [vmem:[%s1431_s10 + $0x38] sm:$0xff] %v712_v14 }
 0x337   : > { %749 = vst [vmem:[%s1431_s10 + $0x60] sm:$0xff] %v717_v15  ;;  %750 = vst [vmem:[%s1431_s10 + $0x68] sm:$0xff] %v718_v26  ;;  %v661_v27 = vpop.permute.xlu1 %660  ;;  %v676_v19 = vpop.permute.xlu0 %675 }
 0x338   : > { %v715_v54 = vmul.f32 %v661_v27, %v1327_v32  ;;  %v716_v20 = vmul.f32 %v661_v27, %v1330_v33  ;;  %v721_v21 = vmul.f32 %v676_v19, %v1241_v0  ;;  %v722_v38 = vmul.f32 %v676_v19, %v1244_v1 }
 0x33a   : > { %747 = vst [vmem:[%s1431_s10 + $0x50] sm:$0xff] %v715_v54  ;;  %748 = vst [vmem:[%s1431_s10 + $0x58] sm:$0xff] %v716_v20 }
 0x33b   : > { %753 = vst [vmem:[%s1431_s10 + $0x80] sm:$0xff] %v721_v21  ;;  %754 = vst [vmem:[%s1431_s10 + $0x88] sm:$0xff] %v722_v38  ;;  %v669_v39 = vpop.permute.xlu1 %668  ;;  %v684_v30 = vpop.permute.xlu0 %683 }
 0x33c   : > { %v719_v57 = vmul.f32 %v669_v39, %v1359_v44  ;;  %v720_v32 = vmul.f32 %v669_v39, %v1362_v45  ;;  %v725_v33 = vmul.f32 %v684_v30, %v1273_v12  ;;  %v726_v0 = vmul.f32 %v684_v30, %v1276_v13 }
 0x33e   : > { %751 = vst [vmem:[%s1431_s10 + $0x70] sm:$0xff] %v719_v57  ;;  %752 = vst [vmem:[%s1431_s10 + $0x78] sm:$0xff] %v720_v32 }
 0x33f   : > { %757 = vst [vmem:[%s1431_s10 + $0xa0] sm:$0xff] %v725_v33  ;;  %758 = vst [vmem:[%s1431_s10 + $0xa8] sm:$0xff] %v726_v0  ;;  %v680_v1 = vpop.permute.xlu1 %679  ;;  %v692_v60 = vpop.permute.xlu0 %691 }
 0x340   : > { %v723_v61 = vmul.f32 %v680_v1, %v1255_v5  ;;  %v724_v44 = vmul.f32 %v680_v1, %v1258_v6  ;;  %v729_v45 = vmul.f32 %v692_v60, %v1305_v24  ;;  %v730_v12 = vmul.f32 %v692_v60, %v1308_v25  ;;  %v1571_v6 = vld [vmem:[#allocation11_spill] sm:$0xff] }
 0x342   : > { %755 = vst [vmem:[%s1431_s10 + $0x90] sm:$0xff] %v723_v61  ;;  %756 = vst [vmem:[%s1431_s10 + $0x98] sm:$0xff] %v724_v44 }
 0x343   : > { %761 = vst [vmem:[%s1431_s10 + $0xc0] sm:$0xff] %v729_v45  ;;  %762 = vst [vmem:[%s1431_s10 + $0xc8] sm:$0xff] %v730_v12  ;;  %v688_v13 = vpop.permute.xlu1 %687  ;;  %v700_v10 = vpop.permute.xlu0 %699 }
 0x344   : > { %v727_v5 = vmul.f32 %v688_v13, %v1289_v18  ;;  %v728_v34 = vmul.f32 %v688_v13, %v1570_v29  ;;  %v733_v3 = vmul.f32 %v700_v10, %v1571_v6  ;;  %v734_v24 = vmul.f32 %v700_v10, %v1572_v35 }
 0x346   : > { %759 = vst [vmem:[%s1431_s10 + $0xb0] sm:$0xff] %v727_v5  ;;  %760 = vst [vmem:[%s1431_s10 + $0xb8] sm:$0xff] %v728_v34 }
 0x347   : > { %765 = vst [vmem:[%s1431_s10 + $0xe0] sm:$0xff] %v733_v3  ;;  %766 = vst [vmem:[%s1431_s10 + $0xe8] sm:$0xff] %v734_v24  ;;  %v696_v25 = vpop.permute.xlu1 %695 }
 0x348   : > { %v731_v7 = vmul.f32 %v696_v25, %v1573_v40  ;;  %v732_v46 = vmul.f32 %v696_v25, %v1574_v11 }
 0x34a   : > { %763 = vst [vmem:[%s1431_s10 + $0xd0] sm:$0xff] %v731_v7  ;;  %764 = vst [vmem:[%s1431_s10 + $0xd8] sm:$0xff] %v732_v46 }
 0x34b   : > { %v704_v18 = vpop.permute.xlu1 %703 }
 0x34c   : > { %v735_v16 = vmul.f32 %v704_v18, %v1575_v62  ;;  %v736_v63 = vmul.f32 %v704_v18, %v1576_v22 }
 0x34e   : > { %767 = vst [vmem:[%s1431_s10 + $0xf0] sm:$0xff] %v735_v16  ;;  %768 = vst [vmem:[%s1431_s10 + $0xf8] sm:$0xff] %v736_v63 }
 0x34f   : > { %1030 = shalt.err (!%p1027_p2)
}
 0x350   : > { %s1031_s15 = scalar_lea.hbm %s1494_s26, 4096  ;;  %s1035_s7 = scalar_lea.hbm %s1549_s5, 8192 }
 0x351   : > { %p1032_p4 = scmp.ne.s32.totalorder %s1494_s26, %s1031_s15  ;;  %p1036_p9 = scmp.lt.u32.totalorder %s1494_s26, %s1549_s5 }
 0x352   : > { %p1037_p1 = scmp.lt.u32.totalorder %s1035_s7, %s1031_s15  ;;  %p1039_p6 = scmp.lt.u32.totalorder %s1031_s15, %s1494_s26 }
 0x353   : > { %p1033_p5 = pnand %p1032_p4, %p1577_p11 }
 0x354   : > { %p1038_p3 = por %p1037_p1, %p1036_p9 }
 0x355   : > { %p1034_p7 = pneg %p1033_p5 }
 0x356   : > { %p1040_p12 = por %p1039_p6, %p1038_p3 }
 0x358   : > { %p1041_p13 = pnand %p1040_p12, %p1034_p7 }
 0x35a   : > { %1044 = shalt.err (!%p1041_p13)
}
 0x35b   : > { %s1092_s25 = smov 256   ;;  %s1093_s13 = smov 16  }
 0x35c   : > { %932 = dma.vmem_to_hbm [thread:$0]  (%p1577_p11), %s1496_s11, 4096, %s1494_s26, %s770_s22, %s1092_s25, %s1092_s25, %s1093_s13  }
 0x35d PF: > { %s799_s17 = sand.u32 1, %s1071_s18   ;;  %p1578_p8 = scmp.ne.s32.totalorder %s1561_s6, 0 }
 0x35e   : > { %p1579_p10 = scmp.ge.s32.totalorder %s1083_s21, 2  ;;  %s800_s28 = scalar_lea.sflag [#allocation4], %s799_s17 }
 0x360   : > { %p939_p0 = pnand %p1579_p10, %p1578_p8 }
 0x362   : > { %1066 = dma.done.wait (!%p939_p0), %s800_s28, 4096  }
 0x363   : > { %1068 = vsyncadd (!%p939_p0), %s800_s28, 4294963200  ;;  %p18_p2 = scmp.ge.s32.totalorder %s1149_s24, 4   ;;  %s1580_s18 = smov %s1075_s19 }
 0x364   : > { %s1581_s19 = smov %s1079_s20  ;;  %s1582_s20 = smov %s1161_s27 }
 0x365   : > { %s1583_s21 = smov %s1149_s24  ;;  %20 = sbr.rel (!%p18_p2) target bundleno = 5 (0x5), region = 85 }
 0x36c   :  { %805 = vsyncpa [#allocation3], 1 }
 0x36d   :  { %807 = vsyncpa [#allocation3 + $0x1], 1 }
 0x36e   :  { %808 = vsyncpa [#allocation4], 1 }
 0x36f   :  { %810 = vsyncpa [#allocation4 + $0x1], 1 }

</bundles_post_ra>
